<compile_context>
chip_gen: v5e
topology: v5e:2x2
jax: 0.10.0
libtpu: 0.0.40
codegen_flags: <defaults>
</compile_context>

<pallas_src>
import jax
import jax.numpy as jnp
from jax import lax
from jax.experimental import pallas as pl
from jax.experimental.pallas import tpu as pltpu


# ----------------------------- Pallas kernel --------------------------------
def topic_att_kernel(values_ref, theta_ref, w_att_ref, b_att_ref,
                     topic_vec_t_ref, w_fc_ref, b_fc_ref, logit_ref):
    # values_ref : (TB, S, 2H) bf16     theta_ref : (TB, 1, K) f32
    TB, S, D2 = values_ref.shape
    vals = values_ref[...]                                   # (TB, S, 2H) bf16
    vals2d = vals.reshape(TB * S, D2)                        # big-M matmul

    # h1 = tanh(fc_att(values)) — bf16 x bf16 MXU, f32 accumulate; tanh -> EUP
    h1 = jnp.tanh(
        jnp.dot(vals2d, w_att_ref[...], preferred_element_type=jnp.float32)
        + b_att_ref[...])                                    # (TB*S, ni) f32

    # scores[s, k] = sum_d h1[s, d] * topic_vec[k, d]
    # topic_vec was pre-transposed to (ni, K) in the wrapper (no in-kernel .T)
    scores = jnp.dot(h1.astype(jnp.bfloat16), topic_vec_t_ref[...],
                     preferred_element_type=jnp.float32)     # (TB*S, K)
    scores = scores.reshape(TB, S, -1)                       # (TB, S, K)

    # softmax over the sequence axis (PyTorch: softmax(score, dim=1));
    # exp -> EUP, denominator reciprocal -> EUP (approx), multiply -> VPU
    m = jnp.max(scores, axis=1, keepdims=True)
    e = jnp.exp(scores - m)
    inv_den = pl.reciprocal(jnp.sum(e, axis=1, keepdims=True), approx=True)
    attn = e * inv_den                                       # (TB, S, K) f32

    # topic_atten[b, s] = sum_k attn[b, s, k] * theta[b, k]  (batched MXU)
    topic_atten = jnp.einsum("bok,bsk->bos", theta_ref[...], attn,
                             preferred_element_type=jnp.float32)  # (TB,1,S)

    # atten_out[b, d] = sum_s topic_atten[b, s] * values[b, s, d]  (MXU, f32)
    atten_out = jnp.einsum("bos,bsd->bod", topic_atten,
                           vals.astype(jnp.float32),
                           preferred_element_type=jnp.float32)[:, 0, :]

    # final classifier + sigmoid (tiny N; keep f32 for accuracy)
    out = jnp.dot(atten_out, w_fc_ref[...].astype(jnp.float32),
                  preferred_element_type=jnp.float32) + b_fc_ref[...]
    logit_ref[...] = jax.nn.sigmoid(out)                     # (TB, L)


def topic_att_pallas(values, theta, w_att, b_att, topic_vec, w_fc, b_fc,
                     *, tb=None):
    B, S, D2 = values.shape
    K, ni = topic_vec.shape
    L = w_fc.shape[1]

    if tb is None:
        # batch several rows per step, but keep >= 2 grid iterations so both
        # v7x TensorCores get work (harmless on single-TC v5e/v6e).
        tb = max(1, B // 2)
    while B % tb:
        tb -= 1
    grid = (B // tb,)

    # bf16 halves HBM->VMEM DMA bytes and uses the bf16 MXU path; theta and
    # biases stay f32 (all accumulation in-kernel is f32).
    values_bf = values.astype(jnp.bfloat16)
    w_att_bf = w_att.astype(jnp.bfloat16)
    topic_vec_t = topic_vec.T.astype(jnp.bfloat16)           # (ni, K)
    w_fc_bf = w_fc.astype(jnp.bfloat16)
    theta3 = theta.reshape(B, 1, K).astype(jnp.float32)

    # NOTE: weight BlockSpecs use a constant index_map (batch-invariant
    # residency; Pallas skips re-DMA when the block index is unchanged).
    return pl.pallas_call(
        topic_att_kernel,
        out_shape=jax.ShapeDtypeStruct((B, L), jnp.float32),
        grid=grid,
        in_specs=[
            pl.BlockSpec((tb, S, D2), lambda b: (b, 0, 0)),   # values (bf16)
            pl.BlockSpec((tb, 1, K),  lambda b: (b, 0, 0)),   # theta  (f32)
            pl.BlockSpec((D2, ni),    lambda b: (0, 0)),      # fc_att weight
            pl.BlockSpec((1, ni),     lambda b: (0, 0)),      # fc_att bias
            pl.BlockSpec((ni, K),     lambda b: (0, 0)),      # topic_vec^T
            pl.BlockSpec((D2, L),     lambda b: (0, 0)),      # fc weight
            pl.BlockSpec((1, L),      lambda b: (0, 0)),      # fc bias
        ],
        out_specs=pl.BlockSpec((tb, L), lambda b: (b, 0)),
        compiler_params=pltpu.CompilerParams(
            dimension_semantics=("parallel",),
            vmem_limit_bytes=32 * 1024 * 1024),
    )(values_bf, theta3, w_att_bf, b_att, topic_vec_t, w_fc_bf, b_fc)


# ------------------------------- JAX glue ------------------------------------
def lstm_dir(xs, Wih, Whh, bih, bhh, hidden):
    # xs: (S, B, E) -> hs: (S, B, hidden)
    B = xs.shape[1]

    def step(carry, x_t):
        h, c = carry
        gates = x_t @ Wih.T + h @ Whh.T + bih + bhh
        i, f, g, o = jnp.split(gates, 4, axis=-1)
        i = jax.nn.sigmoid(i)
        f = jax.nn.sigmoid(f)
        g = jnp.tanh(g)
        o = jax.nn.sigmoid(o)
        c = f * c + i * g
        h = o * jnp.tanh(c)
        return (h, c), h

    h0 = jnp.zeros((B, hidden), jnp.float32)
    c0 = jnp.zeros((B, hidden), jnp.float32)
    _, hs = lax.scan(step, (h0, c0), xs)
    return hs


def bilstm(emb, p, hidden):
    xs = jnp.swapaxes(emb, 0, 1)                                     # (S, B, E)
    hf = lstm_dir(xs, p["Wih_f"], p["Whh_f"], p["bih_f"], p["bhh_f"], hidden)
    hb = lstm_dir(xs[::-1], p["Wih_b"], p["Whh_b"], p["bih_b"], p["bhh_b"],
                  hidden)[::-1]
    H = jnp.concatenate([hf, hb], axis=-1)                           # (S, B, 2H)
    return jnp.swapaxes(H, 0, 1)                                     # (B, S, 2H)


def gsm_eval_theta(text_bow, p):
    # GSM eval branch: theta = softmax(decoder(mean_fc(tanh(enc2(tanh(enc1(bow)))))))
    enc1 = jnp.tanh(text_bow @ p["W_enc1"] + p["b_enc1"])
    enc2 = jnp.tanh(enc1 @ p["W_enc2"] + p["b_enc2"])
    prior_mean = enc2 @ p["W_mean"] + p["b_mean"]
    theta = jax.nn.softmax(prior_mean @ p["W_dec"] + p["b_dec"], axis=-1)
    return theta


def reference_attention(values, theta, w_att, b_att, topic_vec, w_fc, b_fc):
    h1 = jnp.tanh(values @ w_att + b_att)                            # (B,S,ni)
    scores = jnp.einsum("bsd,kd->bsk", h1, topic_vec)                # (B,S,K)
    attn = jax.nn.softmax(scores, axis=1)                            # over seq
    topic_atten = jnp.einsum("bsk,bk->bs", attn, theta)[..., None]   # (B,S,1)
    atten_out = jnp.sum(topic_atten * values, axis=1)                # (B,2H)
    return jax.nn.sigmoid(atten_out @ w_fc + b_fc)


# --------------------------------- main --------------------------------------
if __name__ == "__main__":
    # small, forward-consistent sizes (B=16 so two grid steps of TB=8 rows;
    # per-step fc_att matmul M = TB*S = 128)
    B, S = 16, 16                # batch, padded sequence length
    V, E = 32, 16                # vocab_size, embed dim (word_vec dim)
    H = 16                       # lstm hidden_size  -> 2H = 32
    NI = 16                      # args.ni (topic/word embedding dim) == E
    K = 8                        # num_topic
    ENC = 32                     # enc_nh
    L = 4                        # num_labels
    ALPHA = 1.0

    key = jax.random.PRNGKey(0)
    ks = jax.random.split(key, 22)

    def nrm(k, shape, s=0.1):
        return (s * jax.random.normal(k, shape)).astype(jnp.float32)

    # word embeddings (shared by Embedding / word_vec) and topic_vec
    word_vec = nrm(ks[0], (V, E), 0.5)
    topic_vec = nrm(ks[1], (K, NI), 1.0)

    # LSTM params (single layer, bidirectional)
    lstm_p = {
        "Wih_f": nrm(ks[2], (4 * H, E)), "Whh_f": nrm(ks[3], (4 * H, H)),
        "bih_f": nrm(ks[4], (4 * H,)),   "bhh_f": nrm(ks[5], (4 * H,)),
        "Wih_b": nrm(ks[6], (4 * H, E)), "Whh_b": nrm(ks[7], (4 * H, H)),
        "bih_b": nrm(ks[8], (4 * H,)),   "bhh_b": nrm(ks[9], (4 * H,)),
    }

    # GSM eval-path params (enc1_fc, enc2_fc, mean_fc, decoder)
    gsm_p = {
        "W_enc1": nrm(ks[10], (V, 2 * ENC)), "b_enc1": nrm(ks[11], (2 * ENC,)),
        "W_enc2": nrm(ks[12], (2 * ENC, ENC)), "b_enc2": nrm(ks[13], (ENC,)),
        "W_mean": nrm(ks[14], (ENC, K)), "b_mean": jnp.zeros((K,), jnp.float32),
        "W_dec":  nrm(ks[15], (K, K)),   "b_dec":  jnp.zeros((K,), jnp.float32),
    }

    # Topic_Att params: fc_att (2H -> ni) and fc (2H -> num_labels)
    w_att = nrm(ks[16], (2 * H, NI))
    b_att = nrm(ks[20], (1, NI))
    w_fc = nrm(ks[17], (2 * H, L))
    b_fc = nrm(ks[21], (1, L))

    # deterministic "batched" token indices (output of get_batch_idx) and BOW
    x = jax.random.randint(ks[18], (B, S), 0, V)                     # [B, S]
    text_w = jnp.ones((B, S), jnp.float32)
    text_bow = jax.vmap(
        lambda idx, w: jnp.zeros((V,), jnp.float32).at[idx].add(w))(x, text_w)

    # ---------------- forward pass ----------------
    emb = word_vec[x]                                                # embedding
    values = bilstm(emb, lstm_p, H)                                  # H = lstm(emb)
    theta = gsm_eval_theta(text_bow, gsm_p)                          # w from vtm

    logit = topic_att_pallas(values, theta, w_att, b_att,
                             topic_vec, w_fc, b_fc)
    logit = jax.block_until_ready(logit)

    # correctness check: pure-JAX reference of the same math using the same
    # bf16-rounded inputs the kernel consumes (intermediates in f32)
    def rb(a):
        return a.astype(jnp.bfloat16).astype(jnp.float32)

    ref = reference_attention(rb(values), theta, rb(w_att), b_att,
                              rb(topic_vec), rb(w_fc), b_fc)
    assert logit.shape == (B, L)
    assert jnp.allclose(logit, ref, atol=2e-2, rtol=2e-2), (logit, ref)

    # BCE loss against a deterministic synthetic multi-hot target
    target = (jax.random.uniform(ks[19], (B, L)) > 0.5).astype(jnp.float32)
    eps = 1e-7
    lp = jnp.clip(logit, eps, 1.0 - eps)
    bce = -jnp.mean(target * jnp.log(lp) + (1.0 - target) * jnp.log(1.0 - lp))
    loss = ALPHA * bce  # TODO(synk): + topic_loss (GSM graph losses omitted)
    jax.block_until_ready(loss)

    print("KERNEL_OK")
</pallas_src>

<mosaic_0001>
module attributes {stable_mosaic.version = 11 : i64} {
  func.func @topic_att_kernel(%arg0: i32, %arg1: memref<8x16x32xbf16, #tpu.memory_space<vmem>>, %arg2: memref<8x1x8xf32, #tpu.memory_space<vmem>>, %arg3: memref<32x16xbf16, #tpu.memory_space<vmem>>, %arg4: memref<1x16xf32, #tpu.memory_space<vmem>>, %arg5: memref<16x8xbf16, #tpu.memory_space<vmem>>, %arg6: memref<32x4xbf16, #tpu.memory_space<vmem>>, %arg7: memref<1x4xf32, #tpu.memory_space<vmem>>, %arg8: memref<8x4xf32, #tpu.memory_space<vmem>>) attributes {dimension_semantics = [#tpu.dimension_semantics<parallel>], iteration_bounds = array<i64: 2>, scalar_prefetch = 0 : i64, scratch_operands = 0 : i64, tpu.core_type = #tpu.core_type<tc>, window_params = [{transform_indices = @transform_0, window_bounds = array<i64: 8, 16, 32>}, {transform_indices = @transform_1, window_bounds = array<i64: 8, 1, 8>}, {pipeline_mode = #tpu.pipeline_mode<synchronous>, transform_indices = @transform_2, window_bounds = array<i64: 32, 16>}, {pipeline_mode = #tpu.pipeline_mode<synchronous>, transform_indices = @transform_3, window_bounds = array<i64: 1, 16>}, {pipeline_mode = #tpu.pipeline_mode<synchronous>, transform_indices = @transform_4, window_bounds = array<i64: 16, 8>}, {pipeline_mode = #tpu.pipeline_mode<synchronous>, transform_indices = @transform_5, window_bounds = array<i64: 32, 4>}, {pipeline_mode = #tpu.pipeline_mode<synchronous>, transform_indices = @transform_6, window_bounds = array<i64: 1, 4>}, {transform_indices = @transform_7, window_bounds = array<i64: 8, 4>}]} {
    %c0 = arith.constant 0 : index
    %c0_0 = arith.constant 0 : index
    %c0_1 = arith.constant 0 : index
    %0 = vector.load %arg1[%c0, %c0_0, %c0_1] : memref<8x16x32xbf16, #tpu.memory_space<vmem>>, vector<8x16x32xbf16>
    %1 = vector.shape_cast %0 : vector<8x16x32xbf16> to vector<128x32xbf16>
    %c0_2 = arith.constant 0 : index
    %c0_3 = arith.constant 0 : index
    %2 = vector.load %arg3[%c0_2, %c0_3] : memref<32x16xbf16, #tpu.memory_space<vmem>>, vector<32x16xbf16>
    %cst = arith.constant dense<0.000000e+00> : vector<128x16xf32>
    %3 = tpu.matmul %1, %2, %cst {dimension_numbers = #tpu.dot_dimension_numbers<[1], [0], [0], [1], [0, 0, 1, 1], [], []>} : vector<128x32xbf16>, vector<32x16xbf16>, vector<128x16xf32> -> vector<128x16xf32>
    %c0_4 = arith.constant 0 : index
    %c0_5 = arith.constant 0 : index
    %4 = vector.load %arg4[%c0_4, %c0_5] : memref<1x16xf32, #tpu.memory_space<vmem>>, vector<1x16xf32>
    %5 = vector.broadcast %4 : vector<1x16xf32> to vector<128x16xf32>
    %6 = arith.addf %3, %5 : vector<128x16xf32>
    %7 = math.tanh %6 : vector<128x16xf32>
    %8 = arith.truncf %7 : vector<128x16xf32> to vector<128x16xbf16>
    %c0_6 = arith.constant 0 : index
    %c0_7 = arith.constant 0 : index
    %9 = vector.load %arg5[%c0_6, %c0_7] : memref<16x8xbf16, #tpu.memory_space<vmem>>, vector<16x8xbf16>
    %cst_8 = arith.constant dense<0.000000e+00> : vector<128x8xf32>
    %10 = tpu.matmul %8, %9, %cst_8 {dimension_numbers = #tpu.dot_dimension_numbers<[1], [0], [0], [1], [0, 0, 1, 1], [], []>} : vector<128x16xbf16>, vector<16x8xbf16>, vector<128x8xf32> -> vector<128x8xf32>
    %11 = vector.shape_cast %10 : vector<128x8xf32> to vector<8x16x8xf32>
    %cst_9 = arith.constant dense<0xFF800000> : vector<8x8xf32>
    %12 = vector.multi_reduction <maximumf>, %11, %cst_9 [1] : vector<8x16x8xf32> to vector<8x8xf32>
    %13 = vector.shape_cast %12 : vector<8x8xf32> to vector<8x1x8xf32>
    %14 = vector.broadcast %13 : vector<8x1x8xf32> to vector<8x16x8xf32>
    %15 = arith.subf %11, %14 : vector<8x16x8xf32>
    %16 = math.exp %15 : vector<8x16x8xf32>
    %cst_10 = arith.constant dense<0.000000e+00> : vector<8x8xf32>
    %17 = vector.multi_reduction <add>, %16, %cst_10 [1] : vector<8x16x8xf32> to vector<8x8xf32>
    %18 = vector.shape_cast %17 : vector<8x8xf32> to vector<8x1x8xf32>
    %19 = tpu.reciprocal %18 {approx = true} : vector<8x1x8xf32> -> vector<8x1x8xf32>
    %20 = vector.broadcast %19 : vector<8x1x8xf32> to vector<8x16x8xf32>
    %21 = arith.mulf %16, %20 : vector<8x16x8xf32>
    %c0_11 = arith.constant 0 : index
    %c0_12 = arith.constant 0 : index
    %c0_13 = arith.constant 0 : index
    %22 = vector.load %arg2[%c0_11, %c0_12, %c0_13] : memref<8x1x8xf32, #tpu.memory_space<vmem>>, vector<8x1x8xf32>
    "tpu.trace_start"() <{level = 10 : i32, message = "bok,bsk->bos"}> : () -> ()
    %cst_14 = arith.constant dense<0.000000e+00> : vector<8x1x16xf32>
    %23 = tpu.matmul %22, %21, %cst_14 {dimension_numbers = #tpu.dot_dimension_numbers<[2], [2], [1], [1], [0, 0, 0, 1, 1, 1], [0], [0]>} : vector<8x1x8xf32>, vector<8x16x8xf32>, vector<8x1x16xf32> -> vector<8x1x16xf32>
    "tpu.trace_stop"() : () -> ()
    %24 = arith.extf %0 : vector<8x16x32xbf16> to vector<8x16x32xf32>
    "tpu.trace_start"() <{level = 10 : i32, message = "bos,bsd->bod"}> : () -> ()
    %cst_15 = arith.constant dense<0.000000e+00> : vector<8x1x32xf32>
    %25 = tpu.matmul %23, %24, %cst_15 {dimension_numbers = #tpu.dot_dimension_numbers<[2], [1], [1], [2], [0, 0, 0, 1, 1, 2], [0], [0]>} : vector<8x1x16xf32>, vector<8x16x32xf32>, vector<8x1x32xf32> -> vector<8x1x32xf32>
    "tpu.trace_stop"() : () -> ()
    %26 = vector.shape_cast %25 : vector<8x1x32xf32> to vector<8x32xf32>
    %c0_16 = arith.constant 0 : index
    %c0_17 = arith.constant 0 : index
    %27 = vector.load %arg6[%c0_16, %c0_17] : memref<32x4xbf16, #tpu.memory_space<vmem>>, vector<32x4xbf16>
    %28 = arith.extf %27 : vector<32x4xbf16> to vector<32x4xf32>
    %cst_18 = arith.constant dense<0.000000e+00> : vector<8x4xf32>
    %29 = tpu.matmul %26, %28, %cst_18 {dimension_numbers = #tpu.dot_dimension_numbers<[1], [0], [0], [1], [0, 0, 1, 1], [], []>} : vector<8x32xf32>, vector<32x4xf32>, vector<8x4xf32> -> vector<8x4xf32>
    %c0_19 = arith.constant 0 : index
    %c0_20 = arith.constant 0 : index
    %30 = vector.load %arg7[%c0_19, %c0_20] : memref<1x4xf32, #tpu.memory_space<vmem>>, vector<1x4xf32>
    %31 = vector.broadcast %30 : vector<1x4xf32> to vector<8x4xf32>
    %32 = arith.addf %29, %31 : vector<8x4xf32>
    %33 = arith.negf %32 : vector<8x4xf32>
    %34 = math.exp %33 : vector<8x4xf32>
    %cst_21 = arith.constant 1.000000e+00 : f32
    %35 = vector.broadcast %cst_21 : f32 to vector<8x4xf32>
    %36 = arith.addf %35, %34 : vector<8x4xf32>
    %37 = arith.divf %35, %36 : vector<8x4xf32>
    %c0_22 = arith.constant 0 : index
    %c0_23 = arith.constant 0 : index
    %38 = vector.load %arg8[%c0_22, %c0_23] : memref<8x4xf32, #tpu.memory_space<vmem>>, vector<8x4xf32>
    tpu.vector_store %arg8[%c0_22, %c0_23], %37 {strides = array<i32>} : memref<8x4xf32, #tpu.memory_space<vmem>>, vector<8x4xf32>,
    return
  }
  func.func @transform_0(%arg0: i32) -> (i32, i32, i32) {
    %c0_i32 = arith.constant 0 : i32
    %c0_i32_0 = arith.constant 0 : i32
    %c0_i32_1 = arith.constant 0 : i32
    return %arg0, %c0_i32, %c0_i32_0 : i32, i32, i32
  }
  func.func @transform_1(%arg0: i32) -> (i32, i32, i32) {
    %c0_i32 = arith.constant 0 : i32
    %c0_i32_0 = arith.constant 0 : i32
    %c0_i32_1 = arith.constant 0 : i32
    return %arg0, %c0_i32, %c0_i32_0 : i32, i32, i32
  }
  func.func @transform_2(%arg0: i32) -> (i32, i32) {
    %c0_i32 = arith.constant 0 : i32
    %c0_i32_0 = arith.constant 0 : i32
    %c0_i32_1 = arith.constant 0 : i32
    return %c0_i32, %c0_i32_0 : i32, i32
  }
  func.func @transform_3(%arg0: i32) -> (i32, i32) {
    %c0_i32 = arith.constant 0 : i32
    %c0_i32_0 = arith.constant 0 : i32
    %c0_i32_1 = arith.constant 0 : i32
    return %c0_i32, %c0_i32_0 : i32, i32
  }
  func.func @transform_4(%arg0: i32) -> (i32, i32) {
    %c0_i32 = arith.constant 0 : i32
    %c0_i32_0 = arith.constant 0 : i32
    %c0_i32_1 = arith.constant 0 : i32
    return %c0_i32, %c0_i32_0 : i32, i32
  }
  func.func @transform_5(%arg0: i32) -> (i32, i32) {
    %c0_i32 = arith.constant 0 : i32
    %c0_i32_0 = arith.constant 0 : i32
    %c0_i32_1 = arith.constant 0 : i32
    return %c0_i32, %c0_i32_0 : i32, i32
  }
  func.func @transform_6(%arg0: i32) -> (i32, i32) {
    %c0_i32 = arith.constant 0 : i32
    %c0_i32_0 = arith.constant 0 : i32
    %c0_i32_1 = arith.constant 0 : i32
    return %c0_i32, %c0_i32_0 : i32, i32
  }
  func.func @transform_7(%arg0: i32) -> (i32, i32) {
    %c0_i32 = arith.constant 0 : i32
    %c0_i32_0 = arith.constant 0 : i32
    return %arg0, %c0_i32 : i32, i32
  }
}

</mosaic_0001>

<bundles_post_ra>
// kernel: tpu_custom_call.1
= control target key start
LH: loop header
LB: loop body
LE: loop exit
PB: predicated region body
PF: predicated region fallthrough
CT: control target
= control target key end

     0   :  { %12 = vsyncpa [#allocation3], 0  ;;  %s2056_s0 = inlined_call_operand.hbm [shape: bf16[16,16,32], index: 0, kind: input, shape index: {}]   ;;  %s2057_s1 = inlined_call_operand.vmem [shape: f32[16,1,8], index: 1, kind: input, shape index: {}]   ;;  %s2058_s2 = inlined_call_operand.vmem [shape: bf16[32,16], index: 2, kind: input, shape index: {}]   ;;  %s2059_s3 = inlined_call_operand.vmem [shape: f32[1,16], index: 3, kind: input, shape index: {}]   ;;  %s2060_s4 = inlined_call_operand.vmem [shape: bf16[16,8], index: 4, kind: input, shape index: {}]   ;;  %s2061_s5 = inlined_call_operand.vmem [shape: bf16[32,4], index: 5, kind: input, shape index: {}]   ;;  %s2062_s6 = inlined_call_operand.vmem [shape: f32[1,4], index: 6, kind: input, shape index: {}]   ;;  %s2063_s7 = inlined_call_operand.vmem [shape: f32[16,4], index: 7, kind: output, shape index: {}]  }
   0x1   :  { %14 = vsyncpa [#allocation3 + $0x1], 0  ;;  %s1759_s24 = smov 0   ;;  %s1761_s25 = smov 0  }
   0x2   :  { %s1763_s26 = smov 0   ;;  %s1765_s27 = smov 0  }
   0x3 LB: > { %s1778_s28 = sadd.s32 4294967295, %s1715_s27   ;;  %s1781_s29 = sadd.s32 1, %s1715_s27   ;;  %s1715_s27 = sphi %s1765_s27, %s2070_s27   ;;  %s1711_s26 = sphi %s1763_s26, %s2069_s26   ;;  %s1707_s25 = sphi %s1761_s25, %s2068_s25   ;;  %s1703_s24 = sphi %s1759_s24, %s2067_s24  }
   0x4   : > { %s24_s30 = ssub.s32 %s1715_s27, %s1781_s29  ;;  %s27_s8 = sadd.s32 1, %s1711_s26 }
   0x5   : > { %p25_p0 = scmp.eq.s32.totalorder %s24_s30, 0  ;;  %p34_p1 = scmp.ne.s32.totalorder %s1711_s26, %s1707_s25 }
   0x6   : > { %p35_p2 = scmp.eq.s32.totalorder %s1715_s27, 0  ;;  %p40_p3 = scmp.ne.s32.totalorder %s1707_s25, %s1703_s24 }
   0x7   : > { %s1791_s9 = scalar_select %p25_p0, %s1711_s26, %s27_s8  }
   0x8   : > { %p1793_p4 = por %p35_p2, %p34_p1  ;;  %p41_p5 = scmp.eq.s32.totalorder %s1778_s28, 0 }
   0x9   : > { %p1530_p6 = scmp.lt.s32.totalorder %s1715_s27, 2  ;;  %s236_s12 = sand.u32 1, %s1711_s26  }
   0xa   : > { %p1799_p7 = por %p41_p5, %p40_p3  ;;  %s1395_s13 = sshll.u32 %s236_s12, 6 }
   0xb   : > { %s1500_s14 = sshll.u32 %s1715_s27, 6  ;;  %s240_s18 = scalar_lea.vmem [#allocation2], %s1395_s13 }
   0xc   : > { %s246_s17 = scalar_lea.hbm %s2056_s0, %s1500_s14  ;;  %s249_s19 = sshll.u32 %s240_s18, 4  ;;  %s250_s19 = int_to_ptr.vmem [resolvable:$true] %s249_s19 }
   0xd   : > { %s247_s20 = sshll.u32 %s246_s17, 4  ;;  %p1810_p8 = pnand %p1530_p6, %p1793_p4  ;;  %s248_s20 = int_to_ptr.hbm [resolvable:$true] %s247_s20 }
   0xe   : > { %p1399_p9 = scmp.ge.s32.totalorder %s1715_s27, 1  ;;  %s237_s22 = scalar_lea.sflag [#allocation3], %s236_s12 }
   0xf   : > { %s1651_s23 = sshra.s32 %s248_s20, 4  ;;  %p1655_p11 = pneg %p1810_p8  ;;  %s1652_s23 = int_to_ptr.hbm [resolvable:$true] %s1651_s23 }
  0x10   : > { %s1653_s24 = scalar_lea.hbm %s1652_s23, 64  ;;  %s1658_s13 = scalar_lea.hbm %s2056_s0, 128 }
  0x11   : > { %p1654_p10 = scmp.ne.s32.totalorder %s1652_s23, %s1653_s24  ;;  %p1659_p0 = scmp.lt.s32.totalorder %s1652_s23, %s2056_s0 }
  0x12   : > { %p1660_p1 = scmp.lt.s32.totalorder %s1658_s13, %s1653_s24 }
  0x13   : > { %p1656_p12 = pnand %p1655_p11, %p1654_p10 }
  0x14   : > { %p1661_p2 = por %p1660_p1, %p1659_p0 }
  0x15   : > { %p1657_p13 = pneg %p1656_p12 }
  0x17   : > { %p1662_p3 = pnand %p1661_p2, %p1657_p13 }
  0x19   : > { %1665 = shalt.err (!%p1662_p3)
}
  0x1a   : > { %s1717_s12 = smov 64   ;;  %s1718_s15 = smov 4  }
  0x1b   : > { %1529 = dma.hbm_to_vmem [thread:$0]  (!%p1810_p8), %s248_s20, 1024, %s250_s19, %s237_s22, %s1717_s12, %s1717_s12, %s1718_s15  }
  0x1c   : > { %p265_p4 = scmp.lt.s32.totalorder %s1715_s27, 3 }
  0x1e   : > { %p266_p5 = pnand %p1399_p9, %p265_p4 }
  0x1f   : > { %s271_s16 = sand.u32 (!%p266_p5), 1, %s1707_s25  }
  0x20   : > { %269 = sbr.rel (%p266_p5) target bundleno = 910 (0x38e), region = 48  ;;  %s1400_s17 = sshll.u32 (!%p266_p5), %s271_s16, 6 }
  0x21   : > { %s272_s18 = scalar_lea.sflag (!%p266_p5), [#allocation3], %s271_s16  ;;  %s1829_s23 = scalar_lea.vmem (!%p266_p5), [#allocation2], %s1400_s17 }
  0x25   : > { %1698 = dma.done.wait (%p1799_p7), %s272_s18, 1024  }
  0x26   : > { %1700 = vsyncadd (%p1799_p7), %s272_s18, 4294966272  ;;  %v1510_v0 = vld [vmem:[%s2058_s2 + $0x8] sm:$0xff]  ;;  %v1509_v1 = vld [vmem:[%s2058_s2] sm:$0xff]  ;;  %vm397_vm0 = vcmask 261120   ;;  %vm503_vm1 = vcmask 130048   ;;  %vm577_vm2 = vcmask 64512  }
  0x27   : > { %428 = vmatpush.bf16.msra.mxu0 %v1510_v0  ;;  %1521 = vmatpush.bf16.msra.mxu3 %v1510_v0  ;;  %v1501_v2 = vld [vmem:[%s1829_s23] sm:$0xff]  ;;  %v1507_v3 = vld [vmem:[%s1829_s23 + $0x30] sm:$0xff]  ;;  %v1502_v4 = vld [vmem:[%s1829_s23 + $0x8] sm:$0xff]  ;;  %s1401_s8 = sshll.u32 %s1778_s28, 3  ;;  %vm1255_vm3 = vcmask 1041409   ;;  %vm1258_vm4 = vcmask 1042434  }
  0x28   : > { %v1508_v5 = vld [vmem:[%s1829_s23 + $0x38] sm:$0xff]  ;;  %v1503_v6 = vld [vmem:[%s1829_s23 + $0x10] sm:$0xff]  ;;  %v1505_v8 = vld [vmem:[%s1829_s23 + $0x20] sm:$0xff]  ;;  %p312_p6 = scmp.lt.s32.totalorder %s1401_s8, 15  ;;  %vm1261_vm5 = vcmask 1043459   ;;  %vm1264_vm6 = vcmask 1044484  }
  0x29   : > { %v1504_v7 = vld [vmem:[%s1829_s23 + $0x18] sm:$0xff]  ;;  %v1506_v9 = vld [vmem:[%s1829_s23 + $0x28] sm:$0xff]  ;;  %v1511_v10 = vld [vmem:[%s2060_s4] sm:$0xff]  ;;  %vm1267_vm7 = vcmask 1045509   ;;  %vm1270_vm8 = vcmask 1046534   ;;  %vm1273_vm9 = vcmask 1047559  }
  0x2a   : > { %535 = vmatpush.bf16.msra.mxu1 %v1511_v10  ;;  %1523 = vmatpush.bf16.msra.mxu2 %v1511_v10  ;;  %v1863_v12 = vld [vmem:[%s2059_s3] ss:$0 sm:$0xff]  ;;  %s2072_s8 = smov (!%p312_p6, %s1401_s8), 15  ;;  %p316_p7 = scmp.lt.s32.totalorder %s1778_s28, 1  ;;  %vm1316_vm13 = vcmask 31744  }
  0x2b   : > { %429 = vmatpush.bf16.msra.mxu0 %v1509_v1  ;;  %1522 = vmatpush.bf16.msra.mxu3 %v1509_v1  ;;  %s1951_s14 = scalar_lea.vmem %s2057_s1, %s2072_s8 }
  0x2c   : > { %s2074_s28 = smov (!%p316_p7, %s1778_s28), 1 }
  0x2d   : > { %s1402_s24 = sshll.u32 %s2074_s28, 3 }
  0x2e   : > { %1443 = vmatmul.msk.bf16.vlgmr.msra.gmra.mxu0 %vm397_vm0, %v1501_v2  ;;  %1449 = vmatmul.msk.bf16.vlgmr.msra.gmra.mxu3 %vm397_vm0, %v1507_v3  ;;  %s319_s19 = scalar_lea.vmem %s2063_s7, %s1402_s24 }
  0x3e   : > { %1444 = vmatmul.msk.bf16.gmra.mxu0 %vm397_vm0, %v1502_v4  ;;  %1450 = vmatmul.msk.bf16.gmra.mxu3 %vm397_vm0, %v1508_v5 }
  0x4e   : > { %1445 = vmatmul.msk.bf16.gmra.mxu0 %vm397_vm0, %v1503_v6 }
  0x5e   : > { %1446 = vmatmul.msk.bf16.gmra.mxu0 %vm397_vm0, %v1504_v7 }
  0x6e   : > { %1447 = vmatmul.msk.bf16.gmra.mxu0 %vm397_vm0, %v1505_v8 }
  0x7e   : > { %1448 = vmatmul.msk.bf16.gmra.mxu0 %vm397_vm0, %v1506_v9 }
  0xab   : > { %v431_v11 = vpop.f32.mrf.mxu0 }
  0xac   : > { %v432_v13 = vadd.f32 %v1863_v12, %v431_v11 }
  0xae   : > { %1567 = vtanh.f32 %v432_v13 }
  0xb1   : > { %v461_v14 = vpop.f32.mrf.mxu3 }
  0xb2   : > { %v462_v34 = vadd.f32 %v1863_v12, %v461_v14 }
  0xb3   : > { %v433_v15 = vpop.f32.mrf.mxu0 }
  0xb4   : > { %v434_v16 = vadd.f32 %v1863_v12, %v433_v15  ;;  %v1568_v18 = vpop.eup %1567 }
  0xb6   : > { %1569 = vtanh.f32 %v434_v16 }
  0xb9   : > { %v463_v17 = vpop.f32.mrf.mxu3 }
  0xba   : > { %v464_v37 = vadd.f32 %v1863_v12, %v463_v17 }
  0xbb   : > { %v436_v19 = vpop.f32.mrf.mxu0 }
  0xbc   : > { %v1570_v20 = vpop.eup %1569  ;;  %v437_v22 = vadd.f32 %v1863_v12, %v436_v19 }
  0xbd   : > { %v487_v21 = vpack.c.bf16 %v1570_v20, %v1568_v18 }
  0xbe   : > { %1571 = vtanh.f32 %v437_v22 }
  0xbf   : > { %1455 = vmatmul.msk.bf16.vlgmr.msra.gmra.mxu1 %vm503_vm1, %v487_v21 }
  0xc1   : > { %v466_v23 = vpop.f32.mrf.mxu3 }
  0xc2   : > { %v467_v26 = vadd.f32 %v1863_v12, %v466_v23 }
  0xc3   : > { %v438_v24 = vpop.f32.mrf.mxu0 }
  0xc4   : > { %v439_v25 = vadd.f32 %v1863_v12, %v438_v24  ;;  %v1572_v29 = vpop.eup %1571 }
  0xc6   : > { %1573 = vtanh.f32 %v439_v25 }
  0xc7   : > { %1575 = vtanh.f32 %v467_v26 }
  0xc9   : > { %v468_v27 = vpop.f32.mrf.mxu3 }
  0xca   : > { %v469_v28 = vadd.f32 %v1863_v12, %v468_v27 }
  0xcb   : > { %v441_v30 = vpop.f32.mrf.mxu0 }
  0xcc   : > { %v1574_v31 = vpop.eup %1573  ;;  %1577 = vtanh.f32 %v469_v28  ;;  %v442_v35 = vadd.f32 %v1863_v12, %v441_v30 }
  0xcd   : > { %v488_v32 = vpack.c.bf16 %v1574_v31, %v1572_v29  ;;  %v1576_v33 = vpop.eup %1575  ;;  %1579 = vtanh.f32 %v462_v34 }
  0xce   : > { %1581 = vtanh.f32 %v442_v35 }
  0xcf   : > { %1456 = vmatmul.msk.bf16.gmra.mxu1 %vm503_vm1, %v488_v32 }
  0xd2   : > { %v1578_v36 = vpop.eup %1577 }
  0xd3   : > { %v443_v38 = vpop.f32.mrf.mxu0  ;;  %v494_v39 = vpack.c.bf16 %v1578_v36, %v1576_v33  ;;  %v1580_v41 = vpop.eup %1579 }
  0xd4   : > { %v444_v40 = vadd.f32 %v1863_v12, %v443_v38  ;;  %v1582_v42 = vpop.eup %1581 }
  0xd5   : > { %1462 = vmatmul.msk.bf16.vlgmr.msra.gmra.mxu2 %vm503_vm1, %v494_v39 }
  0xd6   : > { %1583 = vtanh.f32 %v444_v40 }
  0xd7   : > { %1585 = vtanh.f32 %v464_v37 }
  0xdb   : > { %v446_v43 = vpop.f32.mrf.mxu0 }
  0xdc   : > { %v1584_v44 = vpop.eup %1583  ;;  %v447_v48 = vadd.f32 %v1863_v12, %v446_v43 }
  0xdd   : > { %v1586_v45 = vpop.eup %1585  ;;  %v489_v46 = vpack.c.bf16 %v1584_v44, %v1582_v42 }
  0xde   : > { %v493_v47 = vpack.c.bf16 %v1586_v45, %v1580_v41  ;;  %1587 = vtanh.f32 %v447_v48 }
  0xdf   : > { %1457 = vmatmul.msk.bf16.gmra.mxu1 %vm503_vm1, %v489_v46 }
  0xe3   : > { %v448_v49 = vpop.f32.mrf.mxu0 }
  0xe4   : > { %v449_v50 = vadd.f32 %v1863_v12, %v448_v49  ;;  %v1588_v51 = vpop.eup %1587 }
  0xe6   : > { %1589 = vtanh.f32 %v449_v50 }
  0xeb   : > { %v451_v52 = vpop.f32.mrf.mxu0 }
  0xec   : > { %v1590_v53 = vpop.eup %1589  ;;  %v452_v55 = vadd.f32 %v1863_v12, %v451_v52 }
  0xed   : > { %v490_v54 = vpack.c.bf16 %v1590_v53, %v1588_v51 }
  0xee   : > { %1591 = vtanh.f32 %v452_v55 }
  0xef   : > { %1458 = vmatmul.msk.bf16.gmra.mxu1 %vm503_vm1, %v490_v54 }
  0xf3   : > { %v453_v56 = vpop.f32.mrf.mxu0 }
  0xf4   : > { %v454_v57 = vadd.f32 %v1863_v12, %v453_v56  ;;  %v1592_v58 = vpop.eup %1591 }
  0xf6   : > { %1593 = vtanh.f32 %v454_v57 }
  0xfb   : > { %v456_v59 = vpop.f32.mrf.mxu0 }
  0xfc   : > { %v1594_v60 = vpop.eup %1593  ;;  %v457_v62 = vadd.f32 %v1863_v12, %v456_v59 }
  0xfd   : > { %v491_v61 = vpack.c.bf16 %v1594_v60, %v1592_v58 }
  0xfe   : > { %1595 = vtanh.f32 %v457_v62 }
  0xff   : > { %1459 = vmatmul.msk.bf16.gmra.mxu1 %vm503_vm1, %v491_v61 }
 0x103   : > { %v458_v63 = vpop.f32.mrf.mxu0 }
 0x104   : > { %v459_v0 = vadd.f32 %v1863_v12, %v458_v63  ;;  %v1596_v1 = vpop.eup %1595 }
 0x106   : > { %1597 = vtanh.f32 %v459_v0 }
 0x10c   : > { %v1598_v2 = vpop.eup %1597 }
 0x10d   : > { %v492_v3 = vpack.c.bf16 %v1598_v2, %v1596_v1 }
 0x10f   : > { %1460 = vmatmul.msk.bf16.gmra.mxu1 %vm503_vm1, %v492_v3 }
 0x11f   : > { %1461 = vmatmul.msk.bf16.gmra.mxu1 %vm503_vm1, %v493_v47 }
 0x13c   : > { %v537_v4 = vpop.f32.mrf.mxu1 }
 0x13d   : > { %v578_v6 = vsel %vm577_vm2, %v537_v4, -inf }
 0x144   : > { %v539_v5 = vpop.f32.mrf.mxu1 }
 0x145   : > { %v579_v7 = vsel %vm577_vm2, %v539_v5, -inf }
 0x146   : > { %v580_v8 = vmax.f32 %v578_v6, %v579_v7 }
 0x148   : > { %v581_v9 = vrot.slane %v580_v8, 4 }
 0x14a   : > { %v582_v10 = vmax.f32 %v580_v8, %v581_v9 }
 0x14c   : > { %v583_v11 = vrot.slane %v582_v10, 2  ;;  %v542_v12 = vpop.f32.mrf.mxu1 }
 0x14d   : > { %v587_v19 = vsel %vm577_vm2, %v542_v12, -inf }
 0x14e   : > { %v584_v13 = vmax.f32 %v582_v10, %v583_v11 }
 0x150   : > { %v585_v14 = vrot.slane %v584_v13, 1 }
 0x152   : > { %v586_v15 = vmax.f32 %v584_v13, %v585_v14 }
 0x154   : > { %v650_v16 = vsub.f32 %v537_v4, %v586_v15  ;;  %v651_v17 = vsub.f32 %v539_v5, %v586_v15  ;;  %v544_v18 = vpop.f32.mrf.mxu1 }
 0x155   : > { %v588_v20 = vsel %vm577_vm2, %v544_v18, -inf }
 0x156   : > { %v666_v21 = vmul.f32 1.442695, %v650_v16  ;;  %v668_v22 = vmul.f32 1.442695, %v651_v17  ;;  %v589_v23 = vmax.f32 %v587_v19, %v588_v20 }
 0x158   : > { %1599 = vpow2.f32 %v666_v21  ;;  %v590_v24 = vrot.slane %v589_v23, 4  ;;  %v1898_v35 = vpop.f32.mrf.mxu2 }
 0x159   : > { %1601 = vpow2.f32 %v668_v22  ;;  %v641_v58 = vsel %vm577_vm2, %v1898_v35, -inf }
 0x15a   : > { %v591_v25 = vmax.f32 %v589_v23, %v590_v24 }
 0x15c   : > { %v592_v26 = vrot.slane %v591_v25, 2  ;;  %v547_v27 = vpop.f32.mrf.mxu1 }
 0x15d   : > { %v596_v42 = vsel %vm577_vm2, %v547_v27, -inf }
 0x15e   : > { %v1893_v28 = vpop.eup %1599  ;;  %v593_v29 = vmax.f32 %v591_v25, %v592_v26 }
 0x15f   : > { %v1602_v30 = vpop.eup %1601  ;;  %v698_v31 = vsel %vm577_vm2, %v1893_v28, 0.0 }
 0x160   : > { %v699_v32 = vsel %vm577_vm2, %v1602_v30, 0.0  ;;  %v594_v33 = vrot.slane %v593_v29, 1  ;;  %v1902_v51 = vpop.f32.mrf.mxu2 }
 0x161   : > { %v700_v34 = vadd.f32 %v699_v32, %v698_v31  ;;  %v642_v59 = vsel %vm577_vm2, %v1902_v51, -inf }
 0x162   : > { %v595_v36 = vmax.f32 %v593_v29, %v594_v33  ;;  %v643_v1 = vmax.f32 %v641_v58, %v642_v59 }
 0x163   : > { %v701_v37 = vrot.slane %v700_v34, 4 }
 0x164   : > { %v652_v38 = vsub.f32 %v542_v12, %v595_v36  ;;  %v653_v39 = vsub.f32 %v544_v18, %v595_v36  ;;  %v549_v40 = vpop.f32.mrf.mxu1  ;;  %v644_v10 = vrot.slane %v643_v1, 4 }
 0x165   : > { %v702_v41 = vadd.f32 %v701_v37, %v700_v34  ;;  %v597_v43 = vsel %vm577_vm2, %v549_v40, -inf }
 0x166   : > { %v670_v44 = vmul.f32 1.442695, %v652_v38  ;;  %v672_v45 = vmul.f32 1.442695, %v653_v39  ;;  %v598_v46 = vmax.f32 %v596_v42, %v597_v43  ;;  %v645_v18 = vmax.f32 %v643_v1, %v644_v10 }
 0x167   : > { %v703_v47 = vrot.slane %v702_v41, 2 }
 0x168   : > { %1603 = vpow2.f32 %v670_v44  ;;  %v599_v48 = vrot.slane %v598_v46, 4  ;;  %v646_v25 = vrot.slane %v645_v18, 2 }
 0x169   : > { %1605 = vpow2.f32 %v672_v45  ;;  %v704_v49 = vadd.f32 %v703_v47, %v702_v41 }
 0x16a   : > { %v600_v50 = vmax.f32 %v598_v46, %v599_v48  ;;  %v647_v34 = vmax.f32 %v645_v18, %v646_v25 }
 0x16b   : > { %v705_v52 = vrot.slane %v704_v49, 1 }
 0x16c   : > { %v601_v53 = vrot.slane %v600_v50, 2  ;;  %v552_v54 = vpop.f32.mrf.mxu1  ;;  %v648_v43 = vrot.slane %v647_v34, 1 }
 0x16d   : > { %v706_v55 = vadd.f32 %v705_v52, %v704_v49  ;;  %v605_v9 = vsel %vm577_vm2, %v552_v54, -inf }
 0x16e   : > { %v1904_v56 = vpop.eup %1603  ;;  %v602_v57 = vmax.f32 %v600_v50, %v601_v53 }
 0x16f   : > { %v1606_v60 = vpop.eup %1605  ;;  %v707_v61 = vsel %vm577_vm2, %v1904_v56, 0.0  ;;  %1607 = vrcp.f32 %v706_v55 }
 0x170   : > { %v708_v62 = vsel %vm577_vm2, %v1606_v60, 0.0  ;;  %v603_v63 = vrot.slane %v602_v57, 1 }
 0x171   : > { %v709_v0 = vadd.f32 %v708_v62, %v707_v61 }
 0x172   : > { %v604_v2 = vmax.f32 %v602_v57, %v603_v63 }
 0x173   : > { %v710_v3 = vrot.slane %v709_v0, 4 }
 0x174   : > { %v654_v4 = vsub.f32 %v547_v27, %v604_v2  ;;  %v655_v5 = vsub.f32 %v549_v40, %v604_v2  ;;  %v554_v6 = vpop.f32.mrf.mxu1 }
 0x175   : > { %v1608_v7 = vpop.eup %1607  ;;  %v711_v8 = vadd.f32 %v710_v3, %v709_v0  ;;  %v606_v11 = vsel %vm577_vm2, %v554_v6, -inf }
 0x176   : > { %v674_v12 = vmul.f32 1.442695, %v654_v4  ;;  %v676_v13 = vmul.f32 1.442695, %v655_v5  ;;  %v607_v14 = vmax.f32 %v605_v9, %v606_v11  ;;  %v779_v15 = vmul.f32 %v1608_v7, %v1602_v30 }
 0x177   : > { %v712_v16 = vrot.slane %v711_v8, 2  ;;  %v778_v21 = vmul.f32 %v1608_v7, %v1893_v28 }
 0x178   : > { %1609 = vpow2.f32 %v674_v12  ;;  %v608_v17 = vrot.slane %v607_v14, 4  ;;  %1463 = vmatpush.xpose.msk.msrb.mxu2 %vm577_vm2, %v779_v15 }
 0x179   : > { %1611 = vpow2.f32 %v676_v13  ;;  %v713_v19 = vadd.f32 %v712_v16, %v711_v8 }
 0x17a   : > { %v609_v20 = vmax.f32 %v607_v14, %v608_v17 }
 0x17b   : > { %v714_v22 = vrot.slane %v713_v19, 1 }
 0x17c   : > { %v610_v23 = vrot.slane %v609_v20, 2  ;;  %1464 = vmatpush.xpose.msk.msrb.mxu2 %vm577_vm2, %v778_v21  ;;  %v1918_v24 = vpop.f32.mrf.mxu1  ;;  %v794_v21 = vld [vmem:[%s1951_s14] sm:$0x1] }
 0x17d   : > { %v715_v26 = vadd.f32 %v714_v22, %v713_v19  ;;  %v614_v44 = vsel %vm577_vm2, %v1918_v24, -inf }
 0x17e   : > { %v1920_v27 = vpop.eup %1609  ;;  %v611_v29 = vmax.f32 %v609_v20, %v610_v23 }
 0x17f   : > { %v1612_v30 = vpop.eup %1611  ;;  %v716_v31 = vsel %vm577_vm2, %v1920_v27, 0.0  ;;  %1613 = vrcp.f32 %v715_v26  ;;  %1465 = vmatmul.msk.f32.vlgmr.msrb.gmra.mxu2 %vm577_vm2, %v794_v21 }
 0x180   : > { %v717_v32 = vsel %vm577_vm2, %v1612_v30, 0.0  ;;  %v612_v33 = vrot.slane %v611_v29, 1 }
 0x181   : > { %v718_v28 = vadd.f32 %v717_v32, %v716_v31 }
 0x182   : > { %v613_v36 = vmax.f32 %v611_v29, %v612_v33 }
 0x183   : > { %v719_v37 = vrot.slane %v718_v28, 4 }
 0x184   : > { %v656_v38 = vsub.f32 %v552_v54, %v613_v36  ;;  %v657_v39 = vsub.f32 %v554_v6, %v613_v36  ;;  %v559_v40 = vpop.f32.mrf.mxu1  ;;  %v649_v54 = vmax.f32 %v647_v34, %v648_v43  ;;  %v795_v36 = vld [vmem:[%s1951_s14 + $0x1] sm:$0x1] }
 0x185   : > { %v1614_v41 = vpop.eup %1613  ;;  %v720_v42 = vadd.f32 %v719_v37, %v718_v28  ;;  %v615_v45 = vsel %vm577_vm2, %v559_v40, -inf }
 0x186   : > { %v678_v46 = vmul.f32 1.442695, %v656_v38  ;;  %v680_v47 = vmul.f32 1.442695, %v657_v39  ;;  %v616_v48 = vmax.f32 %v614_v44, %v615_v45  ;;  %v781_v49 = vmul.f32 %v1614_v41, %v1606_v60  ;;  %v796_v39 = vld [vmem:[%s1951_s14 + $0x2] sm:$0x1] }
 0x187   : > { %v721_v50 = vrot.slane %v720_v42, 2  ;;  %v780_v57 = vmul.f32 %v1614_v41, %v1904_v56  ;;  %v664_v60 = vsub.f32 %v1898_v35, %v649_v54  ;;  %v665_v2 = vsub.f32 %v1902_v51, %v649_v54 }
 0x188   : > { %1615 = vpow2.f32 %v678_v46  ;;  %v617_v52 = vrot.slane %v616_v48, 4  ;;  %1466 = vmatpush.xpose.msk.msrb.mxu3 %vm577_vm2, %v781_v49 }
 0x189   : > { %v722_v53 = vadd.f32 %v721_v50, %v720_v42  ;;  %1617 = vpow2.f32 %v680_v47  ;;  %v694_v5 = vmul.f32 1.442695, %v664_v60  ;;  %v696_v7 = vmul.f32 1.442695, %v665_v2 }
 0x18a   : > { %v618_v55 = vmax.f32 %v616_v48, %v617_v52 }
 0x18b   : > { %v723_v58 = vrot.slane %v722_v53, 1 }
 0x18c   : > { %v619_v59 = vrot.slane %v618_v55, 2  ;;  %1467 = vmatpush.xpose.msk.msrb.mxu3 %vm577_vm2, %v780_v57  ;;  %v1932_v61 = vpop.f32.mrf.mxu1 }
 0x18d   : > { %v724_v62 = vadd.f32 %v723_v58, %v722_v53  ;;  %v623_v13 = vsel %vm577_vm2, %v1932_v61, -inf }
 0x18e   : > { %v1935_v63 = vpop.eup %1615  ;;  %v620_v0 = vmax.f32 %v618_v55, %v619_v59 }
 0x18f   : > { %v1937_v1 = vpop.eup %1617  ;;  %1619 = vrcp.f32 %v724_v62  ;;  %v725_v56 = vsel %vm577_vm2, %v1935_v63, 0.0  ;;  %1468 = vmatmul.msk.f32.vlgmr.msrb.gmra.mxu3 %vm577_vm2, %v795_v36 }
 0x190   : > { %v726_v3 = vsel %vm577_vm2, %v1937_v1, 0.0  ;;  %v621_v4 = vrot.slane %v620_v0, 1  ;;  %1621 = vpow2.f32 %v694_v5 }
 0x191   : > { %v727_v6 = vadd.f32 %v726_v3, %v725_v56  ;;  %1623 = vpow2.f32 %v696_v7 }
 0x192   : > { %v622_v35 = vmax.f32 %v620_v0, %v621_v4 }
 0x193   : > { %v728_v8 = vrot.slane %v727_v6, 4 }
 0x194   : > { %v658_v9 = vsub.f32 %v1918_v24, %v622_v35  ;;  %v659_v10 = vsub.f32 %v559_v40, %v622_v35  ;;  %v564_v11 = vpop.f32.mrf.mxu1 }
 0x195   : > { %v1620_v12 = vpop.eup %1619  ;;  %v729_v51 = vadd.f32 %v728_v8, %v727_v6  ;;  %v624_v14 = vsel %vm577_vm2, %v564_v11, -inf }
 0x196   : > { %v783_v15 = vmul.f32 %v1620_v12, %v1612_v30  ;;  %v682_v16 = vmul.f32 1.442695, %v658_v9  ;;  %v684_v17 = vmul.f32 1.442695, %v659_v10  ;;  %v625_v18 = vmax.f32 %v623_v13, %v624_v14  ;;  %v1957_v25 = vpop.eup %1621 }
 0x197   : > { %v730_v19 = vrot.slane %v729_v51, 2  ;;  %v782_v24 = vmul.f32 %v1620_v12, %v1920_v27  ;;  %v1962_v31 = vpop.eup %1623  ;;  %v761_v41 = vsel %vm577_vm2, %v1957_v25, 0.0 }
 0x198   : > { %1625 = vpow2.f32 %v682_v16  ;;  %v626_v20 = vrot.slane %v625_v18, 4  ;;  %1469 = vmatpush.xpose.msk.msra.mxu2 %vm577_vm2, %v783_v15  ;;  %v762_v42 = vsel %vm577_vm2, %v1962_v31, 0.0 }
 0x199   : > { %v731_v22 = vadd.f32 %v730_v19, %v729_v51  ;;  %1627 = vpow2.f32 %v684_v17  ;;  %v763_v49 = vadd.f32 %v762_v42, %v761_v41 }
 0x19a   : > { %v627_v23 = vmax.f32 %v625_v18, %v626_v20 }
 0x19b   : > { %v732_v26 = vrot.slane %v731_v22, 1  ;;  %v764_v60 = vrot.slane %v763_v49, 4 }
 0x19c   : > { %v628_v29 = vrot.slane %v627_v23, 2  ;;  %1470 = vmatpush.xpose.msk.msra.mxu2 %vm577_vm2, %v782_v24  ;;  %v1960_v30 = vpop.f32.mrf.mxu1 }
 0x19d   : > { %v733_v32 = vadd.f32 %v732_v26, %v731_v22  ;;  %v632_v52 = vsel %vm577_vm2, %v1960_v30, -inf  ;;  %v765_v6 = vadd.f32 %v764_v60, %v763_v49  ;;  %v326_v60 = vld [vmem:[%s1829_s23 + $0x14] sm:$0xff]  }
 0x19e   : > { %v1964_v33 = vpop.eup %1625  ;;  %v629_v28 = vmax.f32 %v627_v23, %v628_v29  ;;  %v798_v29 = vld [vmem:[%s1951_s14 + $0x4] sm:$0x1] }
 0x19f   : > { %v1628_v34 = vpop.eup %1627  ;;  %1629 = vrcp.f32 %v733_v32  ;;  %v734_v27 = vsel %vm577_vm2, %v1964_v33, 0.0  ;;  %1471 = vmatmul.msk.f32.vlgmr.msra.gmra.mxu2 %vm577_vm2, %v796_v39 }
 0x1a0   : > { %v735_v37 = vsel %vm577_vm2, %v1628_v34, 0.0  ;;  %v630_v38 = vrot.slane %v629_v28, 1 }
 0x1a1   : > { %v736_v40 = vadd.f32 %v735_v37, %v734_v27 }
 0x1a2   : > { %v631_v43 = vmax.f32 %v629_v28, %v630_v38 }
 0x1a3   : > { %v737_v44 = vrot.slane %v736_v40, 4 }
 0x1a4   : > { %v660_v45 = vsub.f32 %v1932_v61, %v631_v43  ;;  %v661_v46 = vsub.f32 %v564_v11, %v631_v43  ;;  %v569_v47 = vpop.f32.mrf.mxu1 }
 0x1a5   : > { %v1630_v48 = vpop.eup %1629  ;;  %v738_v50 = vadd.f32 %v737_v44, %v736_v40  ;;  %v633_v53 = vsel %vm577_vm2, %v569_v47, -inf }
 0x1a6   : > { %v785_v54 = vmul.f32 %v1630_v48, %v1937_v1  ;;  %v686_v55 = vmul.f32 1.442695, %v660_v45  ;;  %v688_v57 = vmul.f32 1.442695, %v661_v46  ;;  %v634_v58 = vmax.f32 %v632_v52, %v633_v53  ;;  %v797_v1 = vld [vmem:[%s1951_s14 + $0x3] sm:$0x1] }
 0x1a7   : > { %v739_v59 = vrot.slane %v738_v50, 2  ;;  %v784_v2 = vmul.f32 %v1630_v48, %v1935_v63  ;;  %v766_v63 = vrot.slane %v765_v6, 2  ;;  %v322_v53 = vld [vmem:[%s1829_s23 + $0x4] sm:$0xff]  }
 0x1a8   : > { %1631 = vpow2.f32 %v686_v55  ;;  %v635_v62 = vrot.slane %v634_v58, 4  ;;  %1472 = vmatpush.xpose.msk.msra.mxu3 %vm577_vm2, %v785_v54  ;;  %v1035_v54 = vunpack.c.l.bf16 %v322_v53 }
 0x1a9   : > { %v740_v61 = vadd.f32 %v739_v59, %v738_v50  ;;  %1633 = vpow2.f32 %v688_v57  ;;  %v767_v17 = vadd.f32 %v766_v63, %v765_v6  ;;  %v801_v50 = vld [vmem:[%s1951_s14 + $0x7] sm:$0x1]  ;;  %v800_v57 = vld [vmem:[%s1951_s14 + $0x6] sm:$0x1]  ;;  %v324_v59 = vld [vmem:[%s1829_s23 + $0xc] sm:$0xff]  }
 0x1aa   : > { %v636_v0 = vmax.f32 %v634_v58, %v635_v62  ;;  %v1037_v62 = vunpack.c.l.bf16 %v324_v59 }
 0x1ab   : > { %v741_v56 = vrot.slane %v740_v61, 1  ;;  %v768_v23 = vrot.slane %v767_v17, 1 }
 0x1ac   : > { %v637_v3 = vrot.slane %v636_v0, 2  ;;  %1473 = vmatpush.xpose.msk.msra.mxu3 %vm577_vm2, %v784_v2  ;;  %v1038_v2 = vunpack.c.h.bf16 %v324_v59 }
 0x1ad   : > { %v742_v4 = vadd.f32 %v741_v56, %v740_v61  ;;  %v769_v28 = vadd.f32 %v768_v23, %v767_v17  ;;  %v1036_v61 = vunpack.c.h.bf16 %v322_v53  ;;  %v328_v56 = vld [vmem:[%s1829_s23 + $0x1c] sm:$0xff]  }
 0x1ae   : > { %v1632_v5 = vpop.eup %1631  ;;  %v638_v35 = vmax.f32 %v636_v0, %v637_v3  ;;  %v1039_v0 = vunpack.c.l.bf16 %v326_v60  ;;  %v1041_v3 = vunpack.c.l.bf16 %v328_v56 }
 0x1af   : > { %v1634_v7 = vpop.eup %1633  ;;  %1635 = vrcp.f32 %v742_v4  ;;  %v743_v8 = vsel %vm577_vm2, %v1632_v5, 0.0  ;;  %1474 = vmatmul.msk.f32.vlgmr.msra.gmra.mxu3 %vm577_vm2, %v797_v1  ;;  %v1040_v1 = vunpack.c.h.bf16 %v326_v60  ;;  %v330_v4 = vld [vmem:[%s1829_s23 + $0x24] sm:$0xff]  }
 0x1b0   : > { %v744_v9 = vsel %vm577_vm2, %v1634_v7, 0.0  ;;  %v639_v10 = vrot.slane %v638_v35, 1 }
 0x1b1   : > { %v745_v11 = vadd.f32 %v744_v9, %v743_v8  ;;  %v332_v8 = vld [vmem:[%s1829_s23 + $0x2c] sm:$0xff]  }
 0x1b2   : > { %v640_v12 = vmax.f32 %v638_v35, %v639_v10  ;;  %v1042_v35 = vunpack.c.h.bf16 %v328_v56  ;;  %v1045_v10 = vunpack.c.l.bf16 %v332_v8 }
 0x1b3   : > { %v746_v51 = vrot.slane %v745_v11, 4 }
 0x1b4   : > { %v662_v13 = vsub.f32 %v1960_v30, %v640_v12  ;;  %v663_v14 = vsub.f32 %v569_v47, %v640_v12  ;;  %v799_v47 = vld [vmem:[%s1951_s14 + $0x5] sm:$0x1]  ;;  %v334_v12 = vld [vmem:[%s1829_s23 + $0x34] sm:$0xff]  }
 0x1b5   : > { %v1636_v15 = vpop.eup %1635  ;;  %v747_v16 = vadd.f32 %v746_v51, %v745_v11  ;;  %v1044_v11 = vunpack.c.h.bf16 %v330_v4  ;;  %v336_v51 = vld [vmem:[%s1829_s23 + $0x3c] sm:$0xf] }
 0x1b6   : > { %v787_v18 = vmul.f32 %v1636_v15, %v1628_v34  ;;  %v690_v19 = vmul.f32 1.442695, %v662_v13  ;;  %v692_v20 = vmul.f32 1.442695, %v663_v14  ;;  %v786_v24 = vmul.f32 %v1636_v15, %v1964_v33 }
 0x1b7   : > { %v748_v21 = vrot.slane %v747_v16, 2  ;;  %v1047_v13 = vunpack.c.l.bf16 %v334_v12  ;;  %v1049_v14 = vunpack.c.l.bf16 %v336_v51  ;;  %v1046_v15 = vunpack.c.h.bf16 %v332_v8 }
 0x1b8   : > { %1637 = vpow2.f32 %v690_v19  ;;  %1475 = vmatpush.xpose.msk.msrb.mxu2 %vm577_vm2, %v787_v18 }
 0x1b9   : > { %v749_v22 = vadd.f32 %v748_v21, %v747_v16  ;;  %1639 = vpow2.f32 %v692_v20  ;;  %v1048_v16 = vunpack.c.h.bf16 %v334_v12  ;;  %v1520_v21 = vld [vmem:[%s2061_s5 + $0x8] sm:$0xff]  }
 0x1ba   : > { %v1518_v23 = vunpack.c.l.bf16 %v1520_v21 }
 0x1bb   : > { %v750_v26 = vrot.slane %v749_v22, 1 }
 0x1bc   : > { %1476 = vmatpush.xpose.msk.msrb.mxu2 %vm577_vm2, %v786_v24  ;;  %v1513_v24 = vld [vmem:[%s2061_s5] sm:$0xff]  }
 0x1bd   : > { %v751_v30 = vadd.f32 %v750_v26, %v749_v22  ;;  %v1519_v22 = vunpack.c.h.bf16 %v1520_v21 }
 0x1be   : > { %v1638_v32 = vpop.eup %1637 }
 0x1bf   : > { %v1640_v27 = vpop.eup %1639  ;;  %1641 = vrcp.f32 %v751_v30  ;;  %v752_v34 = vsel %vm577_vm2, %v1638_v32, 0.0  ;;  %1477 = vmatmul.msk.f32.vlgmr.msrb.gmra.mxu2 %vm577_vm2, %v798_v29  ;;  %v1515_v29 = vunpack.c.h.bf16 %v1513_v24  ;;  %v1514_v30 = vunpack.c.l.bf16 %v1513_v24 }
 0x1c0   : > { %v753_v36 = vsel %vm577_vm2, %v1640_v27, 0.0  ;;  %1643 = vrcp.f32 %v769_v28 }
 0x1c1   : > { %v754_v37 = vadd.f32 %v753_v36, %v752_v34 }
 0x1c3   : > { %v755_v38 = vrot.slane %v754_v37, 4 }
 0x1c5   : > { %v1642_v33 = vpop.eup %1641  ;;  %v756_v39 = vadd.f32 %v755_v38, %v754_v37 }
 0x1c6   : > { %v789_v40 = vmul.f32 %v1642_v33, %v1634_v7  ;;  %v1644_v42 = vpop.eup %1643  ;;  %v788_v44 = vmul.f32 %v1642_v33, %v1632_v5  ;;  %v1043_v5 = vunpack.c.l.bf16 %v330_v4 }
 0x1c7   : > { %v757_v41 = vrot.slane %v756_v39, 2  ;;  %v793_v45 = vmul.f32 %v1644_v42, %v1962_v31  ;;  %v792_v49 = vmul.f32 %v1644_v42, %v1957_v25  ;;  %v321_v25 = vld [vmem:[%s1829_s23] sm:$0xf] }
 0x1c8   : > { %1478 = vmatpush.xpose.msk.msrb.mxu3 %vm577_vm2, %v789_v40  ;;  %v1034_v58 = vunpack.c.l.bf16 %v321_v25 }
 0x1c9   : > { %v758_v43 = vadd.f32 %v757_v41, %v756_v39 }
 0x1cb   : > { %v759_v46 = vrot.slane %v758_v43, 1 }
 0x1cc   : > { %1479 = vmatpush.xpose.msk.msrb.mxu3 %vm577_vm2, %v788_v44 }
 0x1cd   : > { %v760_v48 = vadd.f32 %v759_v46, %v758_v43 }
 0x1cf   : > { %1645 = vrcp.f32 %v760_v48  ;;  %1480 = vmatmul.msk.f32.vlgmr.msrb.gmra.mxu3 %vm577_vm2, %v799_v47 }
 0x1d0   : > { %1484 = vmatpush.xpose.msk.msra.mxu3 %vm577_vm2, %v793_v45 }
 0x1d4   : > { %1485 = vmatpush.xpose.msk.msra.mxu3 %vm577_vm2, %v792_v49 }
 0x1d5   : > { %v1646_v52 = vpop.eup %1645 }
 0x1d6   : > { %v791_v31 = vmul.f32 %v1646_v52, %v1640_v27  ;;  %v790_v55 = vmul.f32 %v1646_v52, %v1638_v32 }
 0x1d7   : > { %1486 = vmatmul.msk.f32.vlgmr.msra.gmra.mxu3 %vm577_vm2, %v801_v50 }
 0x1d8   : > { %1481 = vmatpush.xpose.msk.msra.mxu2 %vm577_vm2, %v791_v31  ;;  %1090 = vmatpush.msrb.mxu3 %v1037_v62  ;;  %v1566_v31 = vld [vmem:[%s2062_s6] ss:$0 sm:$0xff] }
 0x1da   : > { %1091 = vmatpush.msrb.mxu3 %v1036_v61 }
 0x1dc   : > { %1482 = vmatpush.xpose.msk.msra.mxu2 %vm577_vm2, %v790_v55  ;;  %1136 = vmatpush.msra.mxu3 %v1041_v3 }
 0x1de   : > { %1137 = vmatpush.msra.mxu3 %v1040_v1 }
 0x1df   : > { %1483 = vmatmul.msk.f32.vlgmr.msra.gmra.mxu2 %vm577_vm2, %v800_v57 }
 0x1e0   : > { %1067 = vmatpush.msrb.mxu2 %v1035_v54 }
 0x1e2   : > { %1068 = vmatpush.msrb.mxu2 %v1034_v58 }
 0x1e4   : > { %1113 = vmatpush.msra.mxu2 %v1039_v0 }
 0x1e6   : > { %1114 = vmatpush.msra.mxu2 %v1038_v2 }
 0x202   : > { %v828_v6 = vpop.f32.mrf.mxu2 }
 0x203   : > { %1487 = vmatmul.msk.f32.vlgmr.msrb.gmra.mxu2 %vm503_vm1, %v828_v6 }
 0x204   : > { %1159 = vmatpush.msrb.mxu2 %v1043_v5 }
 0x206   : > { %1160 = vmatpush.msrb.mxu2 %v1042_v35 }
 0x212   : > { %v857_v7 = vpop.f32.mrf.mxu3 }
 0x213   : > { %1488 = vmatmul.msk.f32.vlgmr.msrb.gmra.mxu3 %vm503_vm1, %v857_v7 }
 0x214   : > { %1182 = vmatpush.msrb.mxu3 %v1045_v10 }
 0x216   : > { %1183 = vmatpush.msrb.mxu3 %v1044_v11 }
 0x222   : > { %v886_v9 = vpop.f32.mrf.mxu2 }
 0x223   : > { %1489 = vmatmul.msk.f32.vlgmr.msra.gmra.mxu2 %vm503_vm1, %v886_v9 }
 0x224   : > { %1205 = vmatpush.msra.mxu2 %v1047_v13 }
 0x226   : > { %1206 = vmatpush.msra.mxu2 %v1046_v15 }
 0x232   : > { %v915_v63 = vpop.f32.mrf.mxu3 }
 0x233   : > { %1490 = vmatmul.msk.f32.vlgmr.msra.gmra.mxu3 %vm503_vm1, %v915_v63 }
 0x234   : > { %1228 = vmatpush.msra.mxu3 %v1049_v14 }
 0x236   : > { %1229 = vmatpush.msra.mxu3 %v1048_v16 }
 0x242   : > { %v944_v17 = vpop.f32.mrf.mxu2 }
 0x243   : > { %1491 = vmatmul.msk.f32.vlgmr.msrb.gmra.mxu2 %vm503_vm1, %v944_v17 }
 0x244   : > { %1289 = vmatpush.msrb.mxu2 %v1519_v22 }
 0x246   : > { %1290 = vmatpush.msrb.mxu2 %v1518_v23 }
 0x248   : > { %1291 = vmatpush.msrb.mxu2 %v1515_v29 }
 0x24a   : > { %1292 = vmatpush.msrb.mxu2 %v1514_v30 }
 0x252   : > { %v973_v18 = vpop.f32.mrf.mxu3 }
 0x253   : > { %1492 = vmatmul.msk.f32.vlgmr.msrb.gmra.mxu3 %vm503_vm1, %v973_v18 }
 0x25a   : > { %v1031_v19 = vpop.f32.mrf.mxu3 }
 0x25b   : > { %1494 = vmatmul.msk.f32.vlgmr.msra.gmra.mxu3 %vm503_vm1, %v1031_v19 }
 0x262   : > { %v1002_v20 = vpop.f32.mrf.mxu2 }
 0x263   : > { %1493 = vmatmul.msk.f32.vlgmr.msra.gmra.mxu2 %vm503_vm1, %v1002_v20 }
 0x286   : > { %v1070_v32 = vpop.f32.mrf.mxu2 }
 0x296   : > { %v1093_v26 = vpop.f32.mrf.mxu3 }
 0x297   : > { %v1254_v34 = vrot.slane %v1093_v26, 7 }
 0x299   : > { %v1256_v38 = vsel %vm1255_vm3, %v1254_v34, %v1070_v32 }
 0x2a6   : > { %v1116_v27 = vpop.f32.mrf.mxu2 }
 0x2a7   : > { %v1257_v37 = vrot.slane %v1116_v27, 6 }
 0x2a9   : > { %v1259_v40 = vsel %vm1258_vm4, %v1257_v37, %v1256_v38 }
 0x2b6   : > { %v1139_v28 = vpop.f32.mrf.mxu3 }
 0x2b7   : > { %v1260_v39 = vrot.slane %v1139_v28, 5 }
 0x2b9   : > { %v1262_v43 = vsel %vm1261_vm5, %v1260_v39, %v1259_v40 }
 0x2c6   : > { %v1162_v33 = vpop.f32.mrf.mxu2 }
 0x2c7   : > { %v1263_v41 = vrot.slane %v1162_v33, 4 }
 0x2c9   : > { %v1265_v47 = vsel %vm1264_vm6, %v1263_v41, %v1262_v43 }
 0x2d6   : > { %v1185_v36 = vpop.f32.mrf.mxu3 }
 0x2d7   : > { %v1266_v44 = vrot.slane %v1185_v36, 3 }
 0x2d9   : > { %v1268_v49 = vsel %vm1267_vm7, %v1266_v44, %v1265_v47 }
 0x2de   : > { %v1231_v42 = vpop.f32.mrf.mxu3 }
 0x2df   : > { %v1272_v46 = vrot.slane %v1231_v42, 1 }
 0x2e6   : > { %v1208_v45 = vpop.f32.mrf.mxu2 }
 0x2e7   : > { %v1269_v48 = vrot.slane %v1208_v45, 2 }
 0x2e9   : > { %v1271_v50 = vsel %vm1270_vm8, %v1269_v48, %v1268_v49 }
 0x2ea   : > { %v1274_v52 = vsel %vm1273_vm9, %v1272_v46, %v1271_v50 }
 0x2eb   : > { %1495 = vmatmul.msk.f32.vlgmr.msrb.gmra.mxu2 %vm397_vm0, %v1274_v52 }
 0x36e   : > { %v1294_v53 = vpop.f32.mrf.mxu2 }
 0x36f   : > { %v1295_v54 = vadd.f32 %v1566_v31, %v1294_v53 }
 0x371   : > { %v1496_v55 = vmul.f32 -1.442695, %v1295_v54 }
 0x373   : > { %1647 = vpow2.f32 %v1496_v55 }
 0x379   : > { %v1648_v57 = vpop.eup %1647 }
 0x37a   : > { %v1300_v25 = vadd.f32 1.0, %v1648_v57 }
 0x37c   : > { %1649 = vrcp.f32 %v1300_v25  ;;  %v1312_v61 = vand.u32 2147483648, %v1300_v25  ;;  %v1310_v0 = vand.u32 2147483647, %v1300_v25  ;;  %vm1306_vm11 = vweird.f32 %v1300_v25 }
 0x37e   : > { %v1313_v56 = vor.u32 1.1754944e-38, %v1312_v61  ;;  %vm1311_vm14 = vcmp.eq.f32.partialorder %v1310_v0, 8.507059e+37 }
 0x382   : > { %v1650_v58 = vpop.eup %1649 }
 0x383   : > { %v1302_v59 = vmul.f32 %v1650_v58, %v1300_v25  ;;  %vm1307_vm10 = vweird.f32 %v1650_v58 }
 0x384   : > { %vm1308_vm12 = vmor %vm1306_vm11, %vm1307_vm10 }
 0x385   : > { %v1303_v62 = vsub.f32 1.0, %v1302_v59 }
 0x387   : > { %v1304_v60 = vmul.f32 %v1650_v58, %v1303_v62 }
 0x389   : > { %v1305_v2 = vadd.f32 %v1650_v58, %v1304_v60 }
 0x38b   : > { %v1309_v3 = vsel %vm1308_vm12, %v1650_v58, %v1305_v2 }
 0x38c   : > { %v1314_v1 = vsel %vm1311_vm14, %v1313_v56, %v1309_v3 }
 0x38d   : > { %1317 = vst.msk [vmem:[%s319_s19] sm:$0xff] %vm1316_vm13, %v1314_v1 }
 0x38e PF: > { %p17_p8 = scmp.ge.s32.totalorder %s1781_s29, 4   ;;  %s2067_s24 = smov %s1707_s25 }
 0x38f   : > { %s2068_s25 = smov %s1711_s26  ;;  %s2069_s26 = smov %s1791_s9 }
 0x390   : > { %s2070_s27 = smov %s1781_s29  ;;  %19 = sbr.rel (!%p17_p8) target bundleno = 3 (0x3), region = 91 }
 0x395   :  { %1337 = vsyncpa [#allocation3], 1 }
 0x396   :  { %1339 = vsyncpa [#allocation3 + $0x1], 1 }

</bundles_post_ra>
